<compile_context>
chip_gen: v5e
topology: v5e:2x2
jax: 0.10.0
libtpu: 0.0.40
codegen_flags: <defaults>
</compile_context>

<pallas_src>
import jax
import jax.numpy as jnp
from jax.experimental import pallas as pl
from jax.experimental.pallas import tpu as pltpu


def _ds_conv_kernel(e0_ref, o0_ref, e1_ref, o1_ref, e2_ref, o2_ref,
                    w_ref, b_ref, out_ref):
    # e{k}_ref: (tr, Wo+1, Cin) even-W columns of the kh=k input rows
    # o{k}_ref: (tr, Wo,   Cin) odd-W  columns of the kh=k input rows
    # w_ref   : (3, 3, Cin, Coutp)   (kh, kw, ci, co) — resident
    # b_ref   : (1, Coutp) f32       — resident
    # out_ref : (tr, Wo, Coutp)
    tr, wo, coutp = out_ref.shape
    cin = w_ref.shape[2]

    acc = jnp.zeros((tr * wo, coutp), jnp.float32)
    taps = ((e0_ref, o0_ref), (e1_ref, o1_ref), (e2_ref, o2_ref))
    for kh in range(3):
        ev_ref, od_ref = taps[kh]
        # kw = 0 -> even cols [0, Wo); kw = 1 -> odd cols; kw = 2 -> even cols [1, Wo+1)
        windows = (ev_ref[:, 0:wo, :], od_ref[...], ev_ref[:, 1:wo + 1, :])
        for kw in range(3):
            lhs = windows[kw].reshape(tr * wo, cin)
            acc = acc + jnp.dot(lhs, w_ref[kh, kw],
                                preferred_element_type=jnp.float32)

    out = acc + b_ref[...]                              # bias add in f32
    out_ref[...] = out.reshape(tr, wo, coutp).astype(out_ref.dtype)


def my_downsample(x, weight, bias, *, block_pixels=512,
                  compute_dtype=jnp.float32):
    """Forward of MyDownsample (stride-2 3x3 same-channel conv, NCHW in/out).

    x      : (N, C, H, W)  float32
    weight : (C, C, 3, 3)  float32  (PyTorch Conv2d layout)
    bias   : (C,)          float32
    """
    N, C, H, W = x.shape
    c_out = weight.shape[0]
    Ho = (H + 2 - 3) // 2 + 1
    Wo = (W + 2 - 3) // 2 + 1
    M = N * Ho                                           # output rows

    # ---- cheap XLA glue: NHWC + pad(1) + stride-2 row / W-parity views -----
    xt = jnp.transpose(x, (0, 2, 3, 1))                  # (N, H, W, C)
    xp = jnp.pad(xt, ((0, 0), (1, 1), (1, 1), (0, 0)))   # (N, H+2, W+2, C)

    taps = []
    for kh in range(3):
        rows = xp[:, kh:kh + 2 * Ho:2]                   # (N, Ho, W+2, C)
        ev = rows[:, :, 0:2 * Wo + 1:2, :]               # (N, Ho, Wo+1, C)
        od = rows[:, :, 1:2 * Wo:2, :]                   # (N, Ho, Wo,   C)
        taps.append(ev.reshape(M, Wo + 1, C).astype(compute_dtype))
        taps.append(od.reshape(M, Wo, C).astype(compute_dtype))

    # ---- lane-dense weight / bias: pad Cout up to a multiple of 128 --------
    c_out_p = -(-c_out // 128) * 128
    w = jnp.transpose(weight, (2, 3, 1, 0))              # (3, 3, Cin, Cout)
    w = jnp.pad(w, ((0, 0), (0, 0), (0, 0), (0, c_out_p - c_out)))
    w = w.astype(compute_dtype)
    b = jnp.pad(bias.astype(jnp.float32),
                (0, c_out_p - c_out)).reshape(1, c_out_p)

    # ---- tile-size selection (rows of output pixels per grid step) ---------
    esz = jnp.dtype(compute_dtype).itemsize
    tr = max(1, block_pixels // max(Wo, 1))
    tr = min(tr, M)
    min_steps = min(4, M)                 # keep both v7x TCs + pipeline busy
    tr = max(1, min(tr, -(-M // min_steps)))

    def vmem_bytes(t):                    # rough double-buffered estimate
        tap_b = 3 * t * ((Wo + 1) + Wo) * C * esz
        out_b = t * Wo * c_out_p * 4
        wgt_b = 9 * C * c_out_p * esz + c_out_p * 4
        acc_b = t * Wo * c_out_p * 4
        return 2 * (tap_b + out_b) + wgt_b + acc_b

    while tr > 1 and vmem_bytes(tr) > 24 * 1024 * 1024:  # v7x-safe budget
        tr = max(1, tr // 2)

    grid_m = -(-M // tr)
    Mp = grid_m * tr
    if Mp != M:  # small ragged-tail pad on the (already small) tap arrays only
        taps = [jnp.pad(t, ((0, Mp - M), (0, 0), (0, 0))) for t in taps]

    out = pl.pallas_call(
        _ds_conv_kernel,
        out_shape=jax.ShapeDtypeStruct((Mp, Wo, c_out_p), jnp.float32),
        grid_spec=pltpu.PrefetchScalarGridSpec(
            num_scalar_prefetch=0,
            grid=(grid_m,),
            in_specs=[
                pl.BlockSpec((tr, Wo + 1, C), lambda i: (i, 0, 0)),   # e0
                pl.BlockSpec((tr, Wo, C), lambda i: (i, 0, 0)),       # o0
                pl.BlockSpec((tr, Wo + 1, C), lambda i: (i, 0, 0)),   # e1
                pl.BlockSpec((tr, Wo, C), lambda i: (i, 0, 0)),       # o1
                pl.BlockSpec((tr, Wo + 1, C), lambda i: (i, 0, 0)),   # e2
                pl.BlockSpec((tr, Wo, C), lambda i: (i, 0, 0)),       # o2
                pl.BlockSpec((3, 3, C, c_out_p), lambda i: (0, 0, 0, 0)),
                pl.BlockSpec((1, c_out_p), lambda i: (0, 0)),
            ],
            out_specs=pl.BlockSpec((tr, Wo, c_out_p), lambda i: (i, 0, 0)),
        ),
        compiler_params=pltpu.CompilerParams(
            dimension_semantics=("parallel",),
            vmem_limit_bytes=48 * 1024 * 1024,
        ),
    )(*taps, w, b)

    out = out[:M, :, :c_out]                             # drop row/lane padding
    out = out.reshape(N, Ho, Wo, c_out)                  # (N, Ho, Wo, C)
    return jnp.transpose(out, (0, 3, 1, 2))              # back to NCHW


if __name__ == "__main__":
    key = jax.random.PRNGKey(0)
    kx, kw_, kb = jax.random.split(key, 3)

    N, C, H, W = 2, 4, 16, 16
    x = jax.random.normal(kx, (N, C, H, W), dtype=jnp.float32)

    # PyTorch-default-style Conv2d init: uniform(+-1/sqrt(fan_in)), fan_in = C*9.
    fan_in = C * 3 * 3
    bound = 1.0 / (fan_in ** 0.5)
    weight = jax.random.uniform(kw_, (C, C, 3, 3), dtype=jnp.float32,
                                minval=-bound, maxval=bound)
    bias = jax.random.uniform(kb, (C,), dtype=jnp.float32,
                              minval=-bound, maxval=bound)

    # Reference: XLA conv with the exact PyTorch Conv2d semantics.
    ref = jax.lax.conv_general_dilated(
        x, weight, window_strides=(2, 2), padding=((1, 1), (1, 1)),
        dimension_numbers=("NCHW", "OIHW", "NCHW"))
    ref = ref + bias.reshape(1, C, 1, 1)

    # f32 operand path.
    out = jax.block_until_ready(my_downsample(x, weight, bias))
    assert out.shape == (N, C, 8, 8), out.shape
    err = float(jnp.max(jnp.abs(out - ref)))
    assert err < 1e-3, err

    # bf16 operand path (v6e/v7x MXU rate), f32 accumulation — looser tolerance.
    out_bf16 = jax.block_until_ready(
        my_downsample(x, weight, bias, compute_dtype=jnp.bfloat16))
    err_bf16 = float(jnp.max(jnp.abs(out_bf16 - ref)))
    assert err_bf16 < 5e-2, err_bf16

    print("KERNEL_OK")
</pallas_src>

<mosaic_0001>
module attributes {stable_mosaic.version = 11 : i64} {
  func.func @_ds_conv_kernel(%arg0: i32, %arg1: memref<4x9x4xf32, #tpu.memory_space<vmem>>, %arg2: memref<4x8x4xf32, #tpu.memory_space<vmem>>, %arg3: memref<4x9x4xf32, #tpu.memory_space<vmem>>, %arg4: memref<4x8x4xf32, #tpu.memory_space<vmem>>, %arg5: memref<4x9x4xf32, #tpu.memory_space<vmem>>, %arg6: memref<4x8x4xf32, #tpu.memory_space<vmem>>, %arg7: memref<3x3x4x128xf32, #tpu.memory_space<vmem>>, %arg8: memref<1x128xf32, #tpu.memory_space<vmem>>, %arg9: memref<4x8x128xf32, #tpu.memory_space<vmem>>) attributes {dimension_semantics = [#tpu.dimension_semantics<parallel>], iteration_bounds = array<i64: 4>, scalar_prefetch = 0 : i64, scratch_operands = 0 : i64, tpu.core_type = #tpu.core_type<tc>, window_params = [{transform_indices = @transform_0, window_bounds = array<i64: 4, 9, 4>}, {transform_indices = @transform_1, window_bounds = array<i64: 4, 8, 4>}, {transform_indices = @transform_2, window_bounds = array<i64: 4, 9, 4>}, {transform_indices = @transform_3, window_bounds = array<i64: 4, 8, 4>}, {transform_indices = @transform_4, window_bounds = array<i64: 4, 9, 4>}, {transform_indices = @transform_5, window_bounds = array<i64: 4, 8, 4>}, {pipeline_mode = #tpu.pipeline_mode<synchronous>, transform_indices = @transform_6, window_bounds = array<i64: 3, 3, 4, 128>}, {pipeline_mode = #tpu.pipeline_mode<synchronous>, transform_indices = @transform_7, window_bounds = array<i64: 1, 128>}, {transform_indices = @transform_8, window_bounds = array<i64: 4, 8, 128>}]} {
    %cst = arith.constant 0.000000e+00 : f32
    %0 = vector.broadcast %cst : f32 to vector<32x128xf32>
    %c0 = arith.constant 0 : index
    %c0_0 = arith.constant 0 : index
    %c0_1 = arith.constant 0 : index
    %1 = vector.load %arg1[%c0, %c0_0, %c0_1] : memref<4x9x4xf32, #tpu.memory_space<vmem>>, vector<4x8x4xf32>
    %c0_2 = arith.constant 0 : index
    %c0_3 = arith.constant 0 : index
    %c0_4 = arith.constant 0 : index
    %2 = vector.load %arg2[%c0_2, %c0_3, %c0_4] : memref<4x8x4xf32, #tpu.memory_space<vmem>>, vector<4x8x4xf32>
    %c0_5 = arith.constant 0 : index
    %c1 = arith.constant 1 : index
    %c0_6 = arith.constant 0 : index
    %3 = vector.load %arg1[%c0_5, %c1, %c0_6] : memref<4x9x4xf32, #tpu.memory_space<vmem>>, vector<4x8x4xf32>
    %4 = vector.shape_cast %1 : vector<4x8x4xf32> to vector<32x4xf32>
    %c0_7 = arith.constant 0 : index
    %c0_8 = arith.constant 0 : index
    %c0_9 = arith.constant 0 : index
    %c0_10 = arith.constant 0 : index
    %5 = vector.load %arg7[%c0_7, %c0_8, %c0_9, %c0_10] : memref<3x3x4x128xf32, #tpu.memory_space<vmem>>, vector<1x1x4x128xf32>
    %6 = vector.shape_cast %5 : vector<1x1x4x128xf32> to vector<4x128xf32>
    %cst_11 = arith.constant dense<0.000000e+00> : vector<32x128xf32>
    %7 = tpu.matmul %4, %6, %cst_11 {dimension_numbers = #tpu.dot_dimension_numbers<[1], [0], [0], [1], [0, 0, 1, 1], [], []>} : vector<32x4xf32>, vector<4x128xf32>, vector<32x128xf32> -> vector<32x128xf32>
    %8 = arith.addf %0, %7 : vector<32x128xf32>
    %9 = vector.shape_cast %2 : vector<4x8x4xf32> to vector<32x4xf32>
    %c0_12 = arith.constant 0 : index
    %c1_13 = arith.constant 1 : index
    %c0_14 = arith.constant 0 : index
    %c0_15 = arith.constant 0 : index
    %10 = vector.load %arg7[%c0_12, %c1_13, %c0_14, %c0_15] : memref<3x3x4x128xf32, #tpu.memory_space<vmem>>, vector<1x1x4x128xf32>
    %11 = vector.shape_cast %10 : vector<1x1x4x128xf32> to vector<4x128xf32>
    %cst_16 = arith.constant dense<0.000000e+00> : vector<32x128xf32>
    %12 = tpu.matmul %9, %11, %cst_16 {dimension_numbers = #tpu.dot_dimension_numbers<[1], [0], [0], [1], [0, 0, 1, 1], [], []>} : vector<32x4xf32>, vector<4x128xf32>, vector<32x128xf32> -> vector<32x128xf32>
    %13 = arith.addf %8, %12 : vector<32x128xf32>
    %14 = vector.shape_cast %3 : vector<4x8x4xf32> to vector<32x4xf32>
    %c0_17 = arith.constant 0 : index
    %c2 = arith.constant 2 : index
    %c0_18 = arith.constant 0 : index
    %c0_19 = arith.constant 0 : index
    %15 = vector.load %arg7[%c0_17, %c2, %c0_18, %c0_19] : memref<3x3x4x128xf32, #tpu.memory_space<vmem>>, vector<1x1x4x128xf32>
    %16 = vector.shape_cast %15 : vector<1x1x4x128xf32> to vector<4x128xf32>
    %cst_20 = arith.constant dense<0.000000e+00> : vector<32x128xf32>
    %17 = tpu.matmul %14, %16, %cst_20 {dimension_numbers = #tpu.dot_dimension_numbers<[1], [0], [0], [1], [0, 0, 1, 1], [], []>} : vector<32x4xf32>, vector<4x128xf32>, vector<32x128xf32> -> vector<32x128xf32>
    %18 = arith.addf %13, %17 : vector<32x128xf32>
    %c0_21 = arith.constant 0 : index
    %c0_22 = arith.constant 0 : index
    %c0_23 = arith.constant 0 : index
    %19 = vector.load %arg3[%c0_21, %c0_22, %c0_23] : memref<4x9x4xf32, #tpu.memory_space<vmem>>, vector<4x8x4xf32>
    %c0_24 = arith.constant 0 : index
    %c0_25 = arith.constant 0 : index
    %c0_26 = arith.constant 0 : index
    %20 = vector.load %arg4[%c0_24, %c0_25, %c0_26] : memref<4x8x4xf32, #tpu.memory_space<vmem>>, vector<4x8x4xf32>
    %c0_27 = arith.constant 0 : index
    %c1_28 = arith.constant 1 : index
    %c0_29 = arith.constant 0 : index
    %21 = vector.load %arg3[%c0_27, %c1_28, %c0_29] : memref<4x9x4xf32, #tpu.memory_space<vmem>>, vector<4x8x4xf32>
    %22 = vector.shape_cast %19 : vector<4x8x4xf32> to vector<32x4xf32>
    %c1_30 = arith.constant 1 : index
    %c0_31 = arith.constant 0 : index
    %c0_32 = arith.constant 0 : index
    %c0_33 = arith.constant 0 : index
    %23 = vector.load %arg7[%c1_30, %c0_31, %c0_32, %c0_33] : memref<3x3x4x128xf32, #tpu.memory_space<vmem>>, vector<1x1x4x128xf32>
    %24 = vector.shape_cast %23 : vector<1x1x4x128xf32> to vector<4x128xf32>
    %cst_34 = arith.constant dense<0.000000e+00> : vector<32x128xf32>
    %25 = tpu.matmul %22, %24, %cst_34 {dimension_numbers = #tpu.dot_dimension_numbers<[1], [0], [0], [1], [0, 0, 1, 1], [], []>} : vector<32x4xf32>, vector<4x128xf32>, vector<32x128xf32> -> vector<32x128xf32>
    %26 = arith.addf %18, %25 : vector<32x128xf32>
    %27 = vector.shape_cast %20 : vector<4x8x4xf32> to vector<32x4xf32>
    %c1_35 = arith.constant 1 : index
    %c1_36 = arith.constant 1 : index
    %c0_37 = arith.constant 0 : index
    %c0_38 = arith.constant 0 : index
    %28 = vector.load %arg7[%c1_35, %c1_36, %c0_37, %c0_38] : memref<3x3x4x128xf32, #tpu.memory_space<vmem>>, vector<1x1x4x128xf32>
    %29 = vector.shape_cast %28 : vector<1x1x4x128xf32> to vector<4x128xf32>
    %cst_39 = arith.constant dense<0.000000e+00> : vector<32x128xf32>
    %30 = tpu.matmul %27, %29, %cst_39 {dimension_numbers = #tpu.dot_dimension_numbers<[1], [0], [0], [1], [0, 0, 1, 1], [], []>} : vector<32x4xf32>, vector<4x128xf32>, vector<32x128xf32> -> vector<32x128xf32>
    %31 = arith.addf %26, %30 : vector<32x128xf32>
    %32 = vector.shape_cast %21 : vector<4x8x4xf32> to vector<32x4xf32>
    %c1_40 = arith.constant 1 : index
    %c2_41 = arith.constant 2 : index
    %c0_42 = arith.constant 0 : index
    %c0_43 = arith.constant 0 : index
    %33 = vector.load %arg7[%c1_40, %c2_41, %c0_42, %c0_43] : memref<3x3x4x128xf32, #tpu.memory_space<vmem>>, vector<1x1x4x128xf32>
    %34 = vector.shape_cast %33 : vector<1x1x4x128xf32> to vector<4x128xf32>
    %cst_44 = arith.constant dense<0.000000e+00> : vector<32x128xf32>
    %35 = tpu.matmul %32, %34, %cst_44 {dimension_numbers = #tpu.dot_dimension_numbers<[1], [0], [0], [1], [0, 0, 1, 1], [], []>} : vector<32x4xf32>, vector<4x128xf32>, vector<32x128xf32> -> vector<32x128xf32>
    %36 = arith.addf %31, %35 : vector<32x128xf32>
    %c0_45 = arith.constant 0 : index
    %c0_46 = arith.constant 0 : index
    %c0_47 = arith.constant 0 : index
    %37 = vector.load %arg5[%c0_45, %c0_46, %c0_47] : memref<4x9x4xf32, #tpu.memory_space<vmem>>, vector<4x8x4xf32>
    %c0_48 = arith.constant 0 : index
    %c0_49 = arith.constant 0 : index
    %c0_50 = arith.constant 0 : index
    %38 = vector.load %arg6[%c0_48, %c0_49, %c0_50] : memref<4x8x4xf32, #tpu.memory_space<vmem>>, vector<4x8x4xf32>
    %c0_51 = arith.constant 0 : index
    %c1_52 = arith.constant 1 : index
    %c0_53 = arith.constant 0 : index
    %39 = vector.load %arg5[%c0_51, %c1_52, %c0_53] : memref<4x9x4xf32, #tpu.memory_space<vmem>>, vector<4x8x4xf32>
    %40 = vector.shape_cast %37 : vector<4x8x4xf32> to vector<32x4xf32>
    %c2_54 = arith.constant 2 : index
    %c0_55 = arith.constant 0 : index
    %c0_56 = arith.constant 0 : index
    %c0_57 = arith.constant 0 : index
    %41 = vector.load %arg7[%c2_54, %c0_55, %c0_56, %c0_57] : memref<3x3x4x128xf32, #tpu.memory_space<vmem>>, vector<1x1x4x128xf32>
    %42 = vector.shape_cast %41 : vector<1x1x4x128xf32> to vector<4x128xf32>
    %cst_58 = arith.constant dense<0.000000e+00> : vector<32x128xf32>
    %43 = tpu.matmul %40, %42, %cst_58 {dimension_numbers = #tpu.dot_dimension_numbers<[1], [0], [0], [1], [0, 0, 1, 1], [], []>} : vector<32x4xf32>, vector<4x128xf32>, vector<32x128xf32> -> vector<32x128xf32>
    %44 = arith.addf %36, %43 : vector<32x128xf32>
    %45 = vector.shape_cast %38 : vector<4x8x4xf32> to vector<32x4xf32>
    %c2_59 = arith.constant 2 : index
    %c1_60 = arith.constant 1 : index
    %c0_61 = arith.constant 0 : index
    %c0_62 = arith.constant 0 : index
    %46 = vector.load %arg7[%c2_59, %c1_60, %c0_61, %c0_62] : memref<3x3x4x128xf32, #tpu.memory_space<vmem>>, vector<1x1x4x128xf32>
    %47 = vector.shape_cast %46 : vector<1x1x4x128xf32> to vector<4x128xf32>
    %cst_63 = arith.constant dense<0.000000e+00> : vector<32x128xf32>
    %48 = tpu.matmul %45, %47, %cst_63 {dimension_numbers = #tpu.dot_dimension_numbers<[1], [0], [0], [1], [0, 0, 1, 1], [], []>} : vector<32x4xf32>, vector<4x128xf32>, vector<32x128xf32> -> vector<32x128xf32>
    %49 = arith.addf %44, %48 : vector<32x128xf32>
    %50 = vector.shape_cast %39 : vector<4x8x4xf32> to vector<32x4xf32>
    %c2_64 = arith.constant 2 : index
    %c2_65 = arith.constant 2 : index
    %c0_66 = arith.constant 0 : index
    %c0_67 = arith.constant 0 : index
    %51 = vector.load %arg7[%c2_64, %c2_65, %c0_66, %c0_67] : memref<3x3x4x128xf32, #tpu.memory_space<vmem>>, vector<1x1x4x128xf32>
    %52 = vector.shape_cast %51 : vector<1x1x4x128xf32> to vector<4x128xf32>
    %cst_68 = arith.constant dense<0.000000e+00> : vector<32x128xf32>
    %53 = tpu.matmul %50, %52, %cst_68 {dimension_numbers = #tpu.dot_dimension_numbers<[1], [0], [0], [1], [0, 0, 1, 1], [], []>} : vector<32x4xf32>, vector<4x128xf32>, vector<32x128xf32> -> vector<32x128xf32>
    %54 = arith.addf %49, %53 : vector<32x128xf32>
    %c0_69 = arith.constant 0 : index
    %c0_70 = arith.constant 0 : index
    %55 = vector.load %arg8[%c0_69, %c0_70] : memref<1x128xf32, #tpu.memory_space<vmem>>, vector<1x128xf32>
    %56 = vector.broadcast %55 : vector<1x128xf32> to vector<32x128xf32>
    %57 = arith.addf %54, %56 : vector<32x128xf32>
    %58 = vector.shape_cast %57 : vector<32x128xf32> to vector<4x8x128xf32>
    %c0_71 = arith.constant 0 : index
    %c0_72 = arith.constant 0 : index
    %c0_73 = arith.constant 0 : index
    %59 = vector.load %arg9[%c0_71, %c0_72, %c0_73] : memref<4x8x128xf32, #tpu.memory_space<vmem>>, vector<4x8x128xf32>
    tpu.vector_store %arg9[%c0_71, %c0_72, %c0_73], %58 {strides = array<i32>} : memref<4x8x128xf32, #tpu.memory_space<vmem>>, vector<4x8x128xf32>,
    return
  }
  func.func @transform_0(%arg0: i32) -> (i32, i32, i32) {
    %c0_i32 = arith.constant 0 : i32
    %c0_i32_0 = arith.constant 0 : i32
    %c0_i32_1 = arith.constant 0 : i32
    return %arg0, %c0_i32, %c0_i32_0 : i32, i32, i32
  }
  func.func @transform_1(%arg0: i32) -> (i32, i32, i32) {
    %c0_i32 = arith.constant 0 : i32
    %c0_i32_0 = arith.constant 0 : i32
    %c0_i32_1 = arith.constant 0 : i32
    return %arg0, %c0_i32, %c0_i32_0 : i32, i32, i32
  }
  func.func @transform_2(%arg0: i32) -> (i32, i32, i32) {
    %c0_i32 = arith.constant 0 : i32
    %c0_i32_0 = arith.constant 0 : i32
    %c0_i32_1 = arith.constant 0 : i32
    return %arg0, %c0_i32, %c0_i32_0 : i32, i32, i32
  }
  func.func @transform_3(%arg0: i32) -> (i32, i32, i32) {
    %c0_i32 = arith.constant 0 : i32
    %c0_i32_0 = arith.constant 0 : i32
    %c0_i32_1 = arith.constant 0 : i32
    return %arg0, %c0_i32, %c0_i32_0 : i32, i32, i32
  }
  func.func @transform_4(%arg0: i32) -> (i32, i32, i32) {
    %c0_i32 = arith.constant 0 : i32
    %c0_i32_0 = arith.constant 0 : i32
    %c0_i32_1 = arith.constant 0 : i32
    return %arg0, %c0_i32, %c0_i32_0 : i32, i32, i32
  }
  func.func @transform_5(%arg0: i32) -> (i32, i32, i32) {
    %c0_i32 = arith.constant 0 : i32
    %c0_i32_0 = arith.constant 0 : i32
    %c0_i32_1 = arith.constant 0 : i32
    return %arg0, %c0_i32, %c0_i32_0 : i32, i32, i32
  }
  func.func @transform_6(%arg0: i32) -> (i32, i32, i32, i32) {
    %c0_i32 = arith.constant 0 : i32
    %c0_i32_0 = arith.constant 0 : i32
    %c0_i32_1 = arith.constant 0 : i32
    %c0_i32_2 = arith.constant 0 : i32
    %c0_i32_3 = arith.constant 0 : i32
    return %c0_i32, %c0_i32_0, %c0_i32_1, %c0_i32_2 : i32, i32, i32, i32
  }
  func.func @transform_7(%arg0: i32) -> (i32, i32) {
    %c0_i32 = arith.constant 0 : i32
    %c0_i32_0 = arith.constant 0 : i32
    %c0_i32_1 = arith.constant 0 : i32
    return %c0_i32, %c0_i32_0 : i32, i32
  }
  func.func @transform_8(%arg0: i32) -> (i32, i32, i32) {
    %c0_i32 = arith.constant 0 : i32
    %c0_i32_0 = arith.constant 0 : i32
    %c0_i32_1 = arith.constant 0 : i32
    return %arg0, %c0_i32, %c0_i32_0 : i32, i32, i32
  }
}

</mosaic_0001>

<bundles_post_ra>
// kernel: tpu_custom_call.1
= control target key start
LH: loop header
LB: loop body
LE: loop exit
PB: predicated region body
PF: predicated region fallthrough
CT: control target
= control target key end

     0   :  { %13 = vsyncpa [#allocation3], 0  ;;  %s1521_s0 = inlined_call_operand.vmem [shape: f32[16,9,4], index: 0, kind: input, shape index: {}]   ;;  %s1522_s1 = inlined_call_operand.vmem [shape: f32[16,8,4], index: 1, kind: input, shape index: {}]   ;;  %s1523_s2 = inlined_call_operand.vmem [shape: f32[16,9,4], index: 2, kind: input, shape index: {}]   ;;  %s1524_s3 = inlined_call_operand.vmem [shape: f32[16,8,4], index: 3, kind: input, shape index: {}]   ;;  %s1525_s4 = inlined_call_operand.vmem [shape: f32[16,9,4], index: 4, kind: input, shape index: {}]   ;;  %s1526_s5 = inlined_call_operand.vmem [shape: f32[16,8,4], index: 5, kind: input, shape index: {}]   ;;  %s1527_s6 = inlined_call_operand.vmem [shape: f32[3,3,4,128], index: 6, kind: input, shape index: {}]   ;;  %s1528_s7 = inlined_call_operand.vmem [shape: f32[1,128], index: 7, kind: input, shape index: {}]   ;;  %s1529_s8 = inlined_call_operand.hbm [shape: f32[16,8,128], index: 8, kind: output, shape index: {}]  }
   0x1   :  { %15 = vsyncpa [#allocation3 + $0x1], 0  ;;  %s1293_s27 = smov 0   ;;  %s1295_s28 = smov 0  }
   0x2   :  { %s1297_s29 = smov 0   ;;  %s1299_s30 = smov 0  }
   0x3 LB: > { %s1314_s9 = sadd.s32 4294967295, %s1244_s30   ;;  %s1055_s10 = sadd.s32 4294967294, %s1244_s30   ;;  %s1244_s30 = sphi %s1299_s30, %s1535_s30   ;;  %s1240_s29 = sphi %s1297_s29, %s1534_s29   ;;  %s1236_s28 = sphi %s1295_s28, %s1533_s28   ;;  %s1232_s27 = sphi %s1293_s27, %s1532_s27  }
   0x4   : > { %s1318_s11 = sadd.s32 1, %s1244_s30   ;;  %s226_s12 = sadd.s32 1, %s1240_s29 }
   0x5   : > { %s223_s13 = ssub.s32 %s1244_s30, %s1318_s11  ;;  %p236_p0 = scmp.ne.s32.totalorder %s1240_s29, %s1236_s28 }
   0x6   : > { %p224_p1 = scmp.eq.s32.totalorder %s223_s13, 0  ;;  %p237_p2 = scmp.eq.s32.totalorder %s1314_s9, 3 }
   0x7   : > { %p242_p3 = scmp.ne.s32.totalorder %s1236_s28, %s1232_s27  ;;  %p243_p4 = scmp.eq.s32.totalorder %s1055_s10, 3 }
   0x8   : > { %s1329_s14 = scalar_select %p224_p1, %s1240_s29, %s226_s12  }
   0x9   : > { %p1331_p5 = por %p237_p2, %p236_p0  ;;  %p1335_p6 = por %p243_p4, %p242_p3 }
   0xa   : > { %p1058_p7 = scmp.ge.s32.totalorder %s1244_s30, 1  ;;  %p324_p8 = scmp.lt.s32.totalorder %s1244_s30, 5 }
   0xc   : > { %p325_p9 = pnand %p1058_p7, %p324_p8 }
   0xd   : > { %s1060_s19 = sshll.u32 (!%p325_p9), %s1314_s9, 2  ;;  %s1136_s25 = sshll.u32 (!%p325_p9), %s1314_s9, 5 }
   0xe   : > { %328 = sbr.rel (%p325_p9) target bundleno = 232 (0xe8), region = 52  ;;  %p387_p10 = scmp.lt.s32.totalorder (!%p325_p9), %s1060_s19, 15 }
   0xf   : > { %s929_s13 = scalar_lea.hbm (!%p325_p9), %s1529_s8, %s1136_s25 }
  0x10   : > { %s932_s17 = sshll.u32 (!%p325_p9), %s929_s13, 4  ;;  %s933_s17 = int_to_ptr.hbm [resolvable:$true] %s932_s17 }
  0x13   : > { %v1075_v0 = vld [vmem:[%s1527_s6 + $0x4] sm:$0xf]  ;;  %vm454_vm0 = vcmask 1043456   ;;  %v1086_v1 = vld [vmem:[%s1527_s6 + $0x8] sm:$0xf]  ;;  %s1537_s19 = smov (!%p387_p10, %s1060_s19), 15 }
  0x14   : > { %1137 = vmatpush.msk.msra.mxu1 %vm454_vm0, %v1075_v0  ;;  %1138 = vmatpush.msk.msra.mxu2 %vm454_vm0, %v1075_v0  ;;  %v1092_v2 = vld [vmem:[%s1527_s6 + $0xc] sm:$0xf]  ;;  %v438_v3 = vld [vmem:[%s1527_s6] sm:$0xf]  ;;  %v1098_v4 = vld [vmem:[%s1527_s6 + $0x10] sm:$0xf] }
  0x15   : > { %1139 = vmatpush.msk.msra.mxu3 %vm454_vm0, %v1075_v0  ;;  %1076 = vmatpush.msk.msra.mxu0 %vm454_vm0, %v1075_v0  ;;  %s1364_s12 = sshll.u32 %s1537_s19, 3  ;;  %vm441_vm1 = vcmask 31744   ;;  %v1110_v5 = vld [vmem:[%s1527_s6 + $0x18] sm:$0xf]  ;;  %v1116_v6 = vld [vmem:[%s1527_s6 + $0x1c] sm:$0xf] }
  0x16   : > { %1087 = vmatpush.msk.msrb.mxu2 %vm454_vm0, %v1086_v1  ;;  %1081 = vmatpush.msk.msrb.mxu1 %vm454_vm0, %v438_v3  ;;  %s397_s18 = scalar_lea.vmem %s1522_s1, %s1364_s12  ;;  %s1377_s24 = sshll.u32 %s1537_s19, 4  ;;  %v1104_v11 = vld [vmem:[%s1527_s6 + $0x14] sm:$0xf]  ;;  %v1122_v12 = vld [vmem:[%s1527_s6 + $0x20] sm:$0xf] }
  0x17   : > { %1093 = vmatpush.msk.msrb.mxu3 %vm454_vm0, %v1092_v2  ;;  %1099 = vmatpush.msk.msrb.mxu0 %vm454_vm0, %v1098_v4  ;;  %v431_v7 = vld [vmem:[%s397_s18 + $0x8] sm:$0xff]  ;;  %v432_v8 = vld [vmem:[%s397_s18 + $0x10] sm:$0xff]  ;;  %v433_v9 = vld [vmem:[%s397_s18 + $0x18] sm:$0xff]  ;;  %s1393_s20 = scalar_lea.vmem %s1521_s0, %s1377_s24  ;;  %s1401_s22 = scalar_lea.vmem %s1523_s2, %s1377_s24 }
  0x18   : > { %1078 = vmatmul.msk.f32.vlgmr.msra.gmra.mxu1 %vm441_vm1, %v431_v7  ;;  %1079 = vmatmul.msk.f32.vlgmr.msra.gmra.mxu2 %vm441_vm1, %v432_v8  ;;  %v430_v10 = vld [vmem:[%s397_s18] sm:$0xff]  ;;  %s410_s26 = scalar_lea.vmem %s1524_s3, %s1364_s12  ;;  %v427_v17 = vld [vmem:[%s1393_s20 + $0x10] sm:$0xff]  ;;  %s1440_s19 = scalar_lea.vmem %s1525_s4, %s1377_s24 }
  0x19   : > { %1080 = vmatmul.msk.f32.vlgmr.msra.gmra.mxu3 %vm441_vm1, %v433_v9  ;;  %1111 = vmatpush.msk.msra.mxu2 %vm454_vm0, %v1110_v5  ;;  %v426_v13 = vld [vmem:[%s1393_s20] sm:$0xff]  ;;  %v435_v18 = vld [vmem:[%s1393_s20 + $0x11] sm:$0xff]  ;;  %v586_v20 = vld [vmem:[%s410_s26 + $0x8] sm:$0xff]  ;;  %s423_s18 = scalar_lea.vmem %s1526_s5, %s1364_s12  ;;  %s383_s12 = sand.u32 1, %s1236_s28  }
  0x1a   : > { %1077 = vmatmul.msk.f32.vlgmr.msra.gmra.mxu0 %vm441_vm1, %v430_v10  ;;  %1117 = vmatpush.msk.msra.mxu3 %vm454_vm0, %v1116_v6  ;;  %v434_v14 = vld [vmem:[%s1393_s20 + $0x1] sm:$0xff]  ;;  %v582_v19 = vld [vmem:[%s1401_s22 + $0x10] sm:$0xff]  ;;  %v588_v28 = vld [vmem:[%s410_s26 + $0x18] sm:$0xff]  ;;  %s1059_s24 = sshll.u32 %s383_s12, 5  ;;  %s918_s9 = scalar_lea.sflag [#allocation3], %s383_s12 }
  0x1b   : > { %1105 = vmatpush.msk.msra.mxu1 %vm454_vm0, %v1104_v11  ;;  %1123 = vmatpush.msk.msra.mxu0 %vm454_vm0, %v1122_v12  ;;  %v581_v15 = vld [vmem:[%s1401_s22] sm:$0xff]  ;;  %v587_v24 = vld [vmem:[%s410_s26 + $0x10] sm:$0xff]  ;;  %v748_v35 = vld [vmem:[%s423_s18 + $0x8] sm:$0xff]  ;;  %s1481_s23 = scalar_lea.vmem [#allocation2], %s1059_s24 }
  0x1c   : > { %v585_v16 = vld [vmem:[%s410_s26] sm:$0xff]  ;;  %v429_v25 = vld [vmem:[%s1393_s20 + $0x30] sm:$0xff]  ;;  %v750_v43 = vld [vmem:[%s423_s18 + $0x18] sm:$0xff] }
  0x1d   : > { %v428_v21 = vld [vmem:[%s1393_s20 + $0x20] sm:$0xff]  ;;  %v437_v26 = vld [vmem:[%s1393_s20 + $0x31] sm:$0xff] }
  0x1e   : > { %v436_v22 = vld [vmem:[%s1393_s20 + $0x21] sm:$0xff]  ;;  %v584_v27 = vld [vmem:[%s1401_s22 + $0x30] sm:$0xff]  ;;  %s1196_s20 = sshra.s32 %s933_s17, 4  ;;  %s1197_s20 = int_to_ptr.hbm [resolvable:$true] %s1196_s20 }
  0x1f   : > { %v583_v23 = vld [vmem:[%s1401_s22 + $0x20] sm:$0xff]  ;;  %v590_v33 = vld [vmem:[%s1401_s22 + $0x11] sm:$0xff]  ;;  %p1203_p0 = scmp.lt.s32.totalorder %s1197_s20, %s1529_s8 }
  0x20   : > { %1082 = vmatmul.msk.f32.vlgmr.msrb.gmra.mxu1 %vm441_vm1, %v426_v13  ;;  %1088 = vmatmul.msk.f32.vlgmr.msrb.gmra.mxu2 %vm441_vm1, %v434_v14  ;;  %v589_v29 = vld [vmem:[%s1401_s22 + $0x1] sm:$0xff]  ;;  %v744_v34 = vld [vmem:[%s1440_s19 + $0x10] sm:$0xff] }
  0x21   : > { %1094 = vmatmul.msk.f32.vlgmr.msrb.gmra.mxu3 %vm441_vm1, %v581_v15  ;;  %v743_v30 = vld [vmem:[%s1440_s19] sm:$0xff]  ;;  %v752_v36 = vld [vmem:[%s1440_s19 + $0x11] sm:$0xff] }
  0x22   : > { %1100 = vmatmul.msk.f32.vlgmr.msrb.gmra.mxu0 %vm441_vm1, %v585_v16  ;;  %v747_v31 = vld [vmem:[%s423_s18] sm:$0xff]  ;;  %v749_v39 = vld [vmem:[%s423_s18 + $0x10] sm:$0xff]  ;;  %s1198_s18 = scalar_lea.hbm %s1197_s20, 32 }
  0x23   : > { %v751_v32 = vld [vmem:[%s1440_s19 + $0x1] sm:$0xff]  ;;  %v592_v41 = vld [vmem:[%s1401_s22 + $0x31] sm:$0xff]  ;;  %p1199_p11 = scmp.ne.s32.totalorder %s1197_s20, %s1198_s18 }
  0x24   : > { %v591_v37 = vld [vmem:[%s1401_s22 + $0x21] sm:$0xff]  ;;  %v746_v42 = vld [vmem:[%s1440_s19 + $0x30] sm:$0xff]  ;;  %s1202_s22 = scalar_lea.hbm %s1529_s8, 128 }
  0x25   : > { %v745_v38 = vld [vmem:[%s1440_s19 + $0x20] sm:$0xff]  ;;  %v754_v44 = vld [vmem:[%s1440_s19 + $0x31] sm:$0xff]  ;;  %p1200_p12 = pnand %p1199_p11, %p1331_p5  ;;  %p1204_p1 = scmp.lt.s32.totalorder %s1202_s22, %s1198_s18 }
  0x26   : > { %v753_v40 = vld [vmem:[%s1440_s19 + $0x21] sm:$0xff]  ;;  %s930_s19 = sshll.u32 %s1481_s23, 4  ;;  %s931_s19 = int_to_ptr.vmem [resolvable:$true] %s930_s19 }
  0x27   : > { %p1201_p13 = pneg %p1200_p12  ;;  %p1205_p2 = por %p1204_p1, %p1203_p0 }
  0x28   : > { %1083 = vmatmul.msk.f32.gmra.mxu1 %vm441_vm1, %v427_v17  ;;  %1089 = vmatmul.msk.f32.gmra.mxu2 %vm441_vm1, %v435_v18  ;;  %v1181_v17 = vld [vmem:[%s1528_s7] ss:$0 sm:$0xff] }
  0x29   : > { %1095 = vmatmul.msk.f32.gmra.mxu3 %vm441_vm1, %v582_v19  ;;  %p1206_p3 = pnand %p1205_p2, %p1201_p13 }
  0x2a   : > { %1101 = vmatmul.msk.f32.gmra.mxu0 %vm441_vm1, %v586_v20 }
  0x30   : > { %1084 = vmatmul.msk.f32.gmra.mxu1 %vm441_vm1, %v428_v21  ;;  %1090 = vmatmul.msk.f32.gmra.mxu2 %vm441_vm1, %v436_v22 }
  0x31   : > { %1096 = vmatmul.msk.f32.gmra.mxu3 %vm441_vm1, %v583_v23 }
  0x32   : > { %1102 = vmatmul.msk.f32.gmra.mxu0 %vm441_vm1, %v587_v24 }
  0x38   : > { %1085 = vmatmul.msk.f32.gmra.mxu1 %vm441_vm1, %v429_v25  ;;  %1091 = vmatmul.msk.f32.gmra.mxu2 %vm441_vm1, %v437_v26 }
  0x39   : > { %1097 = vmatmul.msk.f32.gmra.mxu3 %vm441_vm1, %v584_v27 }
  0x3a   : > { %1103 = vmatmul.msk.f32.gmra.mxu0 %vm441_vm1, %v588_v28 }
  0x40   : > { %1106 = vmatmul.msk.f32.vlgmr.msra.gmra.mxu1 %vm441_vm1, %v589_v29  ;;  %1112 = vmatmul.msk.f32.vlgmr.msra.gmra.mxu2 %vm441_vm1, %v743_v30 }
  0x41   : > { %1118 = vmatmul.msk.f32.vlgmr.msra.gmra.mxu3 %vm441_vm1, %v747_v31 }
  0x42   : > { %1124 = vmatmul.msk.f32.vlgmr.msra.gmra.mxu0 %vm441_vm1, %v751_v32 }
  0x48   : > { %1107 = vmatmul.msk.f32.gmra.mxu1 %vm441_vm1, %v590_v33  ;;  %1113 = vmatmul.msk.f32.gmra.mxu2 %vm441_vm1, %v744_v34 }
  0x49   : > { %1119 = vmatmul.msk.f32.gmra.mxu3 %vm441_vm1, %v748_v35 }
  0x4a   : > { %1125 = vmatmul.msk.f32.gmra.mxu0 %vm441_vm1, %v752_v36 }
  0x50   : > { %1108 = vmatmul.msk.f32.gmra.mxu1 %vm441_vm1, %v591_v37  ;;  %1114 = vmatmul.msk.f32.gmra.mxu2 %vm441_vm1, %v745_v38 }
  0x51   : > { %1120 = vmatmul.msk.f32.gmra.mxu3 %vm441_vm1, %v749_v39 }
  0x52   : > { %1126 = vmatmul.msk.f32.gmra.mxu0 %vm441_vm1, %v753_v40 }
  0x58   : > { %1109 = vmatmul.msk.f32.gmra.mxu1 %vm441_vm1, %v592_v41  ;;  %1115 = vmatmul.msk.f32.gmra.mxu2 %vm441_vm1, %v746_v42 }
  0x59   : > { %1121 = vmatmul.msk.f32.gmra.mxu3 %vm441_vm1, %v750_v43 }
  0x5a   : > { %1127 = vmatmul.msk.f32.gmra.mxu0 %vm441_vm1, %v754_v44 }
  0x95   : > { %v478_v45 = vpop.f32.mrf.mxu1 }
  0x97   : > { %v475_v46 = vpop.f32.mrf.mxu0 }
  0x9b   : > { %v481_v47 = vpop.f32.mrf.mxu2 }
  0x9c   : > { %v484_v48 = vpop.f32.mrf.mxu3 }
  0x9d   : > { %v519_v49 = vpop.f32.mrf.mxu1 }
  0x9e   : > { %v520_v62 = vadd.f32 %v519_v49, %v475_v46 }
  0x9f   : > { %v677_v50 = vpop.f32.mrf.mxu0 }
  0xa3   : > { %v565_v51 = vpop.f32.mrf.mxu2 }
  0xa4   : > { %v627_v52 = vpop.f32.mrf.mxu3  ;;  %v577_v0 = vadd.f32 %v565_v51, %v520_v62 }
  0xa5   : > { %v522_v53 = vpop.f32.mrf.mxu1 }
  0xa6   : > { %v639_v2 = vadd.f32 %v627_v52, %v577_v0  ;;  %v523_v5 = vadd.f32 %v522_v53, %v478_v45 }
  0xa7   : > { %v680_v54 = vpop.f32.mrf.mxu0 }
  0xa8   : > { %v689_v7 = vadd.f32 %v677_v50, %v639_v2 }
  0xab   : > { %v568_v55 = vpop.f32.mrf.mxu2 }
  0xac   : > { %v630_v56 = vpop.f32.mrf.mxu3  ;;  %v578_v8 = vadd.f32 %v568_v55, %v523_v5 }
  0xad   : > { %v525_v57 = vpop.f32.mrf.mxu1 }
  0xae   : > { %v640_v11 = vadd.f32 %v630_v56, %v578_v8  ;;  %v526_v15 = vadd.f32 %v525_v57, %v481_v47 }
  0xaf   : > { %v683_v58 = vpop.f32.mrf.mxu0 }
  0xb0   : > { %v690_v18 = vadd.f32 %v680_v54, %v640_v11 }
  0xb3   : > { %v571_v59 = vpop.f32.mrf.mxu2 }
  0xb4   : > { %v633_v60 = vpop.f32.mrf.mxu3  ;;  %v579_v19 = vadd.f32 %v571_v59, %v526_v15 }
  0xb5   : > { %v528_v61 = vpop.f32.mrf.mxu1 }
  0xb6   : > { %v641_v25 = vadd.f32 %v633_v60, %v579_v19  ;;  %v529_v29 = vadd.f32 %v528_v61, %v484_v48 }
  0xb7   : > { %v686_v63 = vpop.f32.mrf.mxu0 }
  0xb8   : > { %v691_v31 = vadd.f32 %v683_v58, %v641_v25 }
  0xbb   : > { %v574_v1 = vpop.f32.mrf.mxu2 }
  0xbc   : > { %v636_v3 = vpop.f32.mrf.mxu3  ;;  %v580_v32 = vadd.f32 %v574_v1, %v529_v29 }
  0xbd   : > { %v727_v4 = vpop.f32.mrf.mxu1 }
  0xbe   : > { %v739_v9 = vadd.f32 %v727_v4, %v689_v7  ;;  %v642_v38 = vadd.f32 %v636_v3, %v580_v32 }
  0xbf   : > { %v889_v6 = vpop.f32.mrf.mxu0 }
  0xc0   : > { %v692_v43 = vadd.f32 %v686_v63, %v642_v38 }
  0xc3   : > { %v789_v10 = vpop.f32.mrf.mxu2 }
  0xc4   : > { %v801_v12 = vadd.f32 %v789_v10, %v739_v9  ;;  %v839_v13 = vpop.f32.mrf.mxu3 }
  0xc5   : > { %v730_v14 = vpop.f32.mrf.mxu1 }
  0xc6   : > { %v851_v16 = vadd.f32 %v839_v13, %v801_v12  ;;  %v740_v22 = vadd.f32 %v730_v14, %v690_v18 }
  0xc7   : > { %v892_v21 = vpop.f32.mrf.mxu0 }
  0xc8   : > { %v901_v20 = vadd.f32 %v889_v6, %v851_v16 }
  0xca   : > { %v909_v23 = vadd.f32 %v1181_v17, %v901_v20 }
  0xcb   : > { %v792_v24 = vpop.f32.mrf.mxu2 }
  0xcc   : > { %913 = vst [vmem:[%s1481_s23] sm:$0xff] %v909_v23  ;;  %v802_v26 = vadd.f32 %v792_v24, %v740_v22  ;;  %v842_v27 = vpop.f32.mrf.mxu3 }
  0xcd   : > { %v733_v28 = vpop.f32.mrf.mxu1 }
  0xce   : > { %v852_v30 = vadd.f32 %v842_v27, %v802_v26  ;;  %v741_v34 = vadd.f32 %v733_v28, %v691_v31 }
  0xcf   : > { %v895_v37 = vpop.f32.mrf.mxu0 }
  0xd0   : > { %v902_v33 = vadd.f32 %v892_v21, %v852_v30 }
  0xd2   : > { %v910_v35 = vadd.f32 %v1181_v17, %v902_v33 }
  0xd3   : > { %v795_v36 = vpop.f32.mrf.mxu2 }
  0xd4   : > { %914 = vst [vmem:[%s1481_s23 + $0x8] sm:$0xff] %v910_v35  ;;  %v803_v39 = vadd.f32 %v795_v36, %v741_v34  ;;  %v845_v40 = vpop.f32.mrf.mxu3 }
  0xd5   : > { %v736_v42 = vpop.f32.mrf.mxu1 }
  0xd6   : > { %v853_v41 = vadd.f32 %v845_v40, %v803_v39  ;;  %v742_v45 = vadd.f32 %v736_v42, %v692_v43 }
  0xd7   : > { %v898_v50 = vpop.f32.mrf.mxu0 }
  0xd8   : > { %v903_v44 = vadd.f32 %v895_v37, %v853_v41 }
  0xda   : > { %v911_v46 = vadd.f32 %v1181_v17, %v903_v44 }
  0xdb   : > { %v798_v47 = vpop.f32.mrf.mxu2 }
  0xdc   : > { %915 = vst [vmem:[%s1481_s23 + $0x10] sm:$0xff] %v911_v46  ;;  %v804_v48 = vadd.f32 %v798_v47, %v742_v45  ;;  %v848_v49 = vpop.f32.mrf.mxu3 }
  0xde   : > { %v854_v51 = vadd.f32 %v848_v49, %v804_v48 }
  0xe0   : > { %v904_v52 = vadd.f32 %v898_v50, %v854_v51 }
  0xe2   : > { %v912_v53 = vadd.f32 %v1181_v17, %v904_v52 }
  0xe4   : > { %916 = vst [vmem:[%s1481_s23 + $0x18] sm:$0xff] %v912_v53 }
  0xe5   : > { %1209 = shalt.err (!%p1206_p3)
}
  0xe6   : > { %s1246_s12 = smov 128   ;;  %s1247_s23 = smov 8  }
  0xe7   : > { %1140 = dma.vmem_to_hbm [thread:$0]  (%p1331_p5), %s931_s19, 512, %s933_s17, %s918_s9, %s1246_s12, %s1246_s12, %s1247_s23  }
  0xe8 PF: > { %p1146_p4 = scmp.ge.s32.totalorder %s1244_s30, 2  ;;  %s947_s10 = sand.u32 1, %s1232_s27  }
  0xe9   : > { %s948_s13 = scalar_lea.sflag [#allocation3], %s947_s10 }
  0xea   : > { %p1143_p7 = pnand %p1146_p4, %p1335_p6 }
  0xec   : > { %p1144_p8 = pneg %p1143_p7 }
  0xee   : > { %1227 = dma.done.wait (%p1144_p8), %s948_s13, 512  }
  0xef   : > { %1229 = vsyncadd (%p1144_p8), %s948_s13, 4294966784  ;;  %p18_p9 = scmp.ge.s32.totalorder %s1318_s11, 6   ;;  %s1532_s27 = smov %s1236_s28 }
  0xf0   : > { %s1533_s28 = smov %s1240_s29  ;;  %s1534_s29 = smov %s1329_s14 }
  0xf1   : > { %s1535_s30 = smov %s1318_s11  ;;  %20 = sbr.rel (!%p18_p9) target bundleno = 3 (0x3), region = 110 }
  0xf6   :  { %954 = vsyncpa [#allocation3], 1 }
  0xf7   :  { %956 = vsyncpa [#allocation3 + $0x1], 1 }

</bundles_post_ra>
